<compile_context>
chip_gen: v5e
topology: v5e:2x2
jax: 0.10.0
libtpu: 0.0.40
codegen_flags: <defaults>
</compile_context>

<pallas_src>
import functools

import jax
import jax.numpy as jnp
from jax import lax
from jax.experimental import pallas as pl
from jax.experimental.pallas import tpu as pltpu


_TARGET_BLOCK_ELEMS = 1024 * 1024      # ~4 MiB f32 / ~2 MiB bf16 per input block
_VMEM_LIMIT_BYTES = 32 * 1024 * 1024   # safe on v5e/v6e (128 MiB) and v7x (64 MiB)
_DENSE_MIN_D = 256 * 1024              # per-item path only when D is this large
_MAX_TILE_N = 4096                     # row cap for the batched path


def _elem_pow(x, p_exp):
    """x ** p_exp without routing integer exponents through exp/log (EUP)."""
    if p_exp == 2:
        return x * x
    if isinstance(p_exp, int) and p_exp >= 1:
        return lax.integer_pow(x, p_exp)
    return jnp.power(x, p_exp)


def _tree_sum(parts):
    """Pairwise (log-depth) VALU sum of a list of equally shaped values."""
    while len(parts) > 1:
        nxt = [parts[i] + parts[i + 1] for i in range(0, len(parts) - 1, 2)]
        if len(parts) % 2:
            nxt.append(parts[-1])
        parts = nxt
    return parts[0]


# --------------------- per-item path (large D, D % 128 == 0) -----------------

def _dice_kernel_dense(p_ref, t_ref, loss_ref, num_acc, den_acc, *,
                       smooth, p_exp, r_total, tile_r, need_mask):
    c = pl.program_id(1)
    last = pl.num_programs(1) - 1

    @pl.when(c == 0)
    def _():
        num_acc[...] = jnp.zeros_like(num_acc)
        den_acc[...] = jnp.zeros_like(den_acc)

    pred = p_ref[0].astype(jnp.float32)       # (tile_r, lane), native -> f32
    targ = t_ref[0].astype(jnp.float32)
    groups = tile_r // 8

    def accumulate(valid):
        num_c = pred * targ
        den_c = _elem_pow(pred, p_exp) + _elem_pow(targ, p_exp)
        if valid is not None:
            # Mask the contributions (after pow): unspecified out-of-range data
            # and 0**p (p <= 0) never reach the accumulators.
            num_c = jnp.where(valid, num_c, 0.0)
            den_c = jnp.where(valid, den_c, 0.0)
        if groups > 1:
            # Free sublane-group reshape + VALU tree down to (8, lane): one
            # small accumulator RMW per step instead of a full-tile RMW.
            num_c = num_c.reshape(groups, 8, num_c.shape[-1]).sum(axis=0)
            den_c = den_c.reshape(groups, 8, den_c.shape[-1]).sum(axis=0)
        num_acc[...] += num_c
        den_acc[...] += den_c

    if need_mask:
        # Only the last R-chunk is ragged: keep iota/where off the hot path.
        @pl.when(c < last)
        def _():
            accumulate(None)

        @pl.when(c == last)
        def _():
            rows = lax.broadcasted_iota(jnp.int32, pred.shape, 0) + c * tile_r
            accumulate(rows < r_total)
    else:
        accumulate(None)

    @pl.when(c == last)
    def _():
        num = jnp.sum(num_acc[...]) + smooth
        den = jnp.sum(den_acc[...]) + smooth
        loss_ref[...] = jnp.broadcast_to(1.0 - num / den, (1, 1, 1))


def _dice_rows_dense(pred2d, targ2d, smooth, p_exp):
    """[N, D] -> [N, R, lane] per-item sublane-dense path (large D)."""
    n, d = pred2d.shape
    cands = [l for l in (512, 256, 128) if d % l == 0]
    lane = None
    for cand in cands:
        if d // cand >= 64:
            lane = cand
            break
    if lane is None:
        lane = cands[-1]
    r = d // lane
    tile_r = max(8, min((_TARGET_BLOCK_ELEMS // lane) // 8 * 8, (r // 8) * 8))
    num_chunks = pl.cdiv(r, tile_r)
    need_mask = (r % tile_r != 0)

    pred3d = pred2d.reshape(n, r, lane)   # contiguous reshape: no copy
    targ3d = targ2d.reshape(n, r, lane)

    kernel = functools.partial(
        _dice_kernel_dense, smooth=float(smooth), p_exp=p_exp,
        r_total=r, tile_r=tile_r, need_mask=need_mask)

    # TODO(synk): on v7x with N == 1 the only "parallel" axis is the batch
    # axis; a leading core-split of the chunk axis would engage both
    # TensorCores for that case.
    out = pl.pallas_call(
        kernel,
        out_shape=jax.ShapeDtypeStruct((n, 1, 1), jnp.float32),
        grid_spec=pltpu.PrefetchScalarGridSpec(
            num_scalar_prefetch=0,
            grid=(n, num_chunks),
            in_specs=[
                pl.BlockSpec((1, tile_r, lane), lambda i, c: (i, c, 0)),
                pl.BlockSpec((1, tile_r, lane), lambda i, c: (i, c, 0)),
            ],
            out_specs=pl.BlockSpec((1, 1, 1), lambda i, c: (i, 0, 0)),
            scratch_shapes=[
                pltpu.VMEM((8, lane), jnp.float32),   # numerator partials
                pltpu.VMEM((8, lane), jnp.float32),   # denominator partials
            ],
        ),
        compiler_params=pltpu.CompilerParams(
            dimension_semantics=("parallel", "arbitrary"),
            vmem_limit_bytes=_VMEM_LIMIT_BYTES,
        ),
    )(pred3d, targ3d)
    return out.reshape(n)


# ------------------- batched path (small / ragged D, any N) ------------------

def _dice_kernel_batched(p_ref, t_ref, loss_ref, num_acc, den_acc, *,
                         smooth, p_exp, d_total, tile_d, lane_groups, need_mask):
    j = pl.program_id(1)
    last = pl.num_programs(1) - 1

    @pl.when(j == 0)
    def _():
        num_acc[...] = jnp.zeros_like(num_acc)
        den_acc[...] = jnp.zeros_like(den_acc)

    pred = p_ref[...].astype(jnp.float32)     # (tile_n, tile_d), native -> f32
    targ = t_ref[...].astype(jnp.float32)

    def fold(x):
        # Lane-preserving fold into (tile_n, 128): 128-aligned lane slices are
        # free vreg-column selects; the tree sum is pure VALU (no XLU).
        if lane_groups == 1:
            return x
        return _tree_sum([x[:, k * 128:(k + 1) * 128] for k in range(lane_groups)])

    def accumulate(valid):
        num_c = pred * targ
        den_c = _elem_pow(pred, p_exp) + _elem_pow(targ, p_exp)
        if valid is not None:
            num_c = jnp.where(valid, num_c, 0.0)
            den_c = jnp.where(valid, den_c, 0.0)
        num_acc[...] += fold(num_c)
        den_acc[...] += fold(den_c)

    if need_mask:
        @pl.when(j < last)
        def _():
            accumulate(None)

        @pl.when(j == last)
        def _():
            cols = lax.broadcasted_iota(jnp.int32, pred.shape, 1) + j * tile_d
            accumulate(cols < d_total)
    else:
        accumulate(None)

    @pl.when(j == last)
    def _():
        num = jnp.sum(num_acc[...], axis=1, keepdims=True) + smooth
        den = jnp.sum(den_acc[...], axis=1, keepdims=True) + smooth
        loss_ref[...] = 1.0 - num / den


def _tiles_2d(n, d):
    target = _TARGET_BLOCK_ELEMS
    # Rows per block: full batch if it fits, else a multiple of 8.
    if n <= 8:
        tile_n = n
    else:
        rows = target // max(d, 1)
        if rows >= n:
            tile_n = n
        else:
            tile_n = max(8, min((rows // 8) * 8, _MAX_TILE_N))
    # Columns per block: full D when small, else a multiple of 128 (ragged
    # last chunk handled by in-kernel masking, never by padding).
    budget = max(128, target // max(tile_n, 1))
    if d <= 128:
        tile_d = d
    elif d % 128 == 0:
        tile_d = max(128, min(d, (budget // 128) * 128))
    else:
        tile_d = max(128, min((d // 128) * 128, (budget // 128) * 128))
    return tile_n, tile_d


def _dice_rows_batched(pred2d, targ2d, smooth, p_exp):
    n, d = pred2d.shape
    tile_n, tile_d = _tiles_2d(n, d)
    n_blocks = pl.cdiv(n, tile_n)
    d_chunks = pl.cdiv(d, tile_d)
    need_mask = (d % tile_d != 0)
    if tile_d % 128 == 0:
        lane_groups = tile_d // 128
        acc_w = 128
    else:                      # only when tile_d == d <= 128
        lane_groups = 1
        acc_w = tile_d

    kernel = functools.partial(
        _dice_kernel_batched, smooth=float(smooth), p_exp=p_exp,
        d_total=d, tile_d=tile_d, lane_groups=lane_groups, need_mask=need_mask)

    out = pl.pallas_call(
        kernel,
        out_shape=jax.ShapeDtypeStruct((n, 1), jnp.float32),
        grid_spec=pltpu.PrefetchScalarGridSpec(
            num_scalar_prefetch=0,
            grid=(n_blocks, d_chunks),
            in_specs=[
                pl.BlockSpec((tile_n, tile_d), lambda i, j: (i, j)),
                pl.BlockSpec((tile_n, tile_d), lambda i, j: (i, j)),
            ],
            out_specs=pl.BlockSpec((tile_n, 1), lambda i, j: (i, 0)),
            scratch_shapes=[
                pltpu.VMEM((tile_n, acc_w), jnp.float32),
                pltpu.VMEM((tile_n, acc_w), jnp.float32),
            ],
        ),
        compiler_params=pltpu.CompilerParams(
            dimension_semantics=("parallel", "arbitrary"),
            vmem_limit_bytes=_VMEM_LIMIT_BYTES,
        ),
    )(pred2d, targ2d)
    return out[:, 0]


# --------------------------------- wrapper -----------------------------------

def binary_dice_loss(predict, target, smooth=1.0, p=2, reduction="mean"):
    """Pallas TPU implementation of BinaryDiceLoss.forward."""
    assert predict.shape[0] == target.shape[0], \
        "predict & target batch size don't match"
    n = predict.shape[0]
    # Flatten [N, *] -> [N, D]: contiguous reshape, no copy, no dtype cast.
    pred2d = predict.reshape(n, -1)
    targ2d = target.reshape(n, -1)
    d = pred2d.shape[1]

    if d % 128 == 0 and d >= _DENSE_MIN_D:
        loss = _dice_rows_dense(pred2d, targ2d, smooth, p)
    else:
        loss = _dice_rows_batched(pred2d, targ2d, smooth, p)

    if reduction == "mean":
        return jnp.mean(loss)
    elif reduction == "sum":
        return jnp.sum(loss)
    elif reduction == "none":
        return loss
    else:
        raise Exception("Unexpected reduction {}".format(reduction))


def _reference(predict, target, smooth=1.0, p=2, reduction="mean"):
    n = predict.shape[0]
    pr = predict.reshape(n, -1).astype(jnp.float32)
    tg = target.reshape(n, -1).astype(jnp.float32)
    num = jnp.sum(pr * tg, axis=1) + smooth
    den = jnp.sum(pr ** p + tg ** p, axis=1) + smooth
    loss = 1.0 - num / den
    if reduction == "mean":
        return jnp.mean(loss)
    elif reduction == "sum":
        return jnp.sum(loss)
    return loss


if __name__ == "__main__":
    key = jax.random.PRNGKey(0)
    k1, k2, k3, k4, k5, k6 = jax.random.split(key, 6)

    # 1) Batched path, lane-dense single block: NCHW probs/mask, D = 4*16*16.
    N, C, H, W = 2, 4, 16, 16
    predict = jax.nn.sigmoid(jax.random.normal(k1, (N, C, H, W), jnp.float32))
    target = (jax.random.uniform(k2, (N, C, H, W)) > 0.5).astype(jnp.float32)
    out = jax.block_until_ready(
        binary_dice_loss(predict, target, smooth=1.0, p=2, reduction="mean"))
    ref = _reference(predict, target, smooth=1.0, p=2, reduction="mean")
    assert jnp.allclose(out, ref, atol=1e-5, rtol=1e-5), (out, ref)

    # 2) Batched path with ragged D chunking + lane mask: D = 3*9*9 = 243.
    predict2 = jax.nn.sigmoid(jax.random.normal(k3, (2, 3, 9, 9), jnp.float32))
    target2 = (jax.random.uniform(k4, (2, 3, 9, 9)) > 0.5).astype(jnp.float32)
    out2 = jax.block_until_ready(
        binary_dice_loss(predict2, target2, reduction="none"))
    ref2 = _reference(predict2, target2, reduction="none")
    assert jnp.allclose(out2, ref2, atol=1e-5, rtol=1e-5), (out2, ref2)

    # 3) Per-item dense path (bf16 inputs) with a ragged sublane chunk:
    #    D = 515*512 = 263680 (multiple of 128, >= _DENSE_MIN_D).
    D3 = 515 * 512
    predict3 = jax.nn.sigmoid(jax.random.normal(k5, (2, D3), jnp.bfloat16))
    target3 = (jax.random.uniform(k6, (2, D3)) > 0.5).astype(jnp.bfloat16)
    out3 = jax.block_until_ready(
        binary_dice_loss(predict3, target3, reduction="sum"))
    ref3 = _reference(predict3, target3, reduction="sum")
    assert jnp.allclose(out3, ref3, atol=1e-4, rtol=1e-4), (out3, ref3)

    print("KERNEL_OK")
</pallas_src>

<mosaic_0001>
module attributes {stable_mosaic.version = 11 : i64} {
  func.func @_dice_kernel_batched(%arg0: i32, %arg1: i32, %arg2: memref<2x1024xf32, #tpu.memory_space<vmem>>, %arg3: memref<2x1024xf32, #tpu.memory_space<vmem>>, %arg4: memref<2x1xf32, #tpu.memory_space<vmem>>, %arg5: memref<2x128xf32, #tpu.memory_space<vmem>>, %arg6: memref<2x128xf32, #tpu.memory_space<vmem>>) attributes {dimension_semantics = [#tpu.dimension_semantics<parallel>, #tpu.dimension_semantics<arbitrary>], iteration_bounds = array<i64: 1, 1>, scalar_prefetch = 0 : i64, scratch_operands = 2 : i64, tpu.core_type = #tpu.core_type<tc>, window_params = [{transform_indices = @transform_0, window_bounds = array<i64: 2, 1024>}, {transform_indices = @transform_1, window_bounds = array<i64: 2, 1024>}, {transform_indices = @transform_2, window_bounds = array<i64: 2, 1>}]} {
    %c0_i32 = arith.constant 0 : i32
    %0 = arith.cmpi eq, %arg1, %c0_i32 : i32
    %1 = arith.extui %0 : i1 to i32
    %c0_i32_0 = arith.constant 0 : i32
    %2 = arith.cmpi ne, %1, %c0_i32_0 : i32
    scf.if %2 {
      %cst = arith.constant 0.000000e+00 : f32
      %48 = vector.broadcast %cst : f32 to vector<2x128xf32>
      %c0_14 = arith.constant 0 : index
      %c0_15 = arith.constant 0 : index
      %49 = vector.load %arg5[%c0_14, %c0_15] : memref<2x128xf32, #tpu.memory_space<vmem>>, vector<2x128xf32>
      tpu.vector_store %arg5[%c0_14, %c0_15], %48 {strides = array<i32>} : memref<2x128xf32, #tpu.memory_space<vmem>>, vector<2x128xf32>,
      %cst_16 = arith.constant 0.000000e+00 : f32
      %50 = vector.broadcast %cst_16 : f32 to vector<2x128xf32>
      %c0_17 = arith.constant 0 : index
      %c0_18 = arith.constant 0 : index
      %51 = vector.load %arg6[%c0_17, %c0_18] : memref<2x128xf32, #tpu.memory_space<vmem>>, vector<2x128xf32>
      tpu.vector_store %arg6[%c0_17, %c0_18], %50 {strides = array<i32>} : memref<2x128xf32, #tpu.memory_space<vmem>>, vector<2x128xf32>,
    } else {
    }
    %c0 = arith.constant 0 : index
    %c0_1 = arith.constant 0 : index
    %3 = vector.load %arg2[%c0, %c0_1] : memref<2x1024xf32, #tpu.memory_space<vmem>>, vector<2x1024xf32>
    %c0_2 = arith.constant 0 : index
    %c0_3 = arith.constant 0 : index
    %4 = vector.load %arg3[%c0_2, %c0_3] : memref<2x1024xf32, #tpu.memory_space<vmem>>, vector<2x1024xf32>
    %5 = arith.mulf %3, %4 : vector<2x1024xf32>
    %6 = arith.mulf %3, %3 : vector<2x1024xf32>
    %7 = arith.mulf %4, %4 : vector<2x1024xf32>
    %8 = arith.addf %6, %7 : vector<2x1024xf32>
    %c0_4 = arith.constant 0 : index
    %c0_5 = arith.constant 0 : index
    %9 = vector.load %arg5[%c0_4, %c0_5] : memref<2x128xf32, #tpu.memory_space<vmem>>, vector<2x128xf32>
    %10 = vector.extract_strided_slice %5 {offsets = [0, 0], sizes = [2, 128], strides = [1, 1]} : vector<2x1024xf32> to vector<2x128xf32>
    %11 = vector.extract_strided_slice %5 {offsets = [0, 128], sizes = [2, 128], strides = [1, 1]} : vector<2x1024xf32> to vector<2x128xf32>
    %12 = vector.extract_strided_slice %5 {offsets = [0, 256], sizes = [2, 128], strides = [1, 1]} : vector<2x1024xf32> to vector<2x128xf32>
    %13 = vector.extract_strided_slice %5 {offsets = [0, 384], sizes = [2, 128], strides = [1, 1]} : vector<2x1024xf32> to vector<2x128xf32>
    %14 = vector.extract_strided_slice %5 {offsets = [0, 512], sizes = [2, 128], strides = [1, 1]} : vector<2x1024xf32> to vector<2x128xf32>
    %15 = vector.extract_strided_slice %5 {offsets = [0, 640], sizes = [2, 128], strides = [1, 1]} : vector<2x1024xf32> to vector<2x128xf32>
    %16 = vector.extract_strided_slice %5 {offsets = [0, 768], sizes = [2, 128], strides = [1, 1]} : vector<2x1024xf32> to vector<2x128xf32>
    %17 = vector.extract_strided_slice %5 {offsets = [0, 896], sizes = [2, 128], strides = [1, 1]} : vector<2x1024xf32> to vector<2x128xf32>
    %18 = arith.addf %10, %11 : vector<2x128xf32>
    %19 = arith.addf %12, %13 : vector<2x128xf32>
    %20 = arith.addf %14, %15 : vector<2x128xf32>
    %21 = arith.addf %16, %17 : vector<2x128xf32>
    %22 = arith.addf %18, %19 : vector<2x128xf32>
    %23 = arith.addf %20, %21 : vector<2x128xf32>
    %24 = arith.addf %22, %23 : vector<2x128xf32>
    %25 = arith.addf %9, %24 : vector<2x128xf32>
    %c0_6 = arith.constant 0 : index
    %c0_7 = arith.constant 0 : index
    %26 = vector.load %arg5[%c0_6, %c0_7] : memref<2x128xf32, #tpu.memory_space<vmem>>, vector<2x128xf32>
    tpu.vector_store %arg5[%c0_6, %c0_7], %25 {strides = array<i32>} : memref<2x128xf32, #tpu.memory_space<vmem>>, vector<2x128xf32>,
    %c0_8 = arith.constant 0 : index
    %c0_9 = arith.constant 0 : index
    %27 = vector.load %arg6[%c0_8, %c0_9] : memref<2x128xf32, #tpu.memory_space<vmem>>, vector<2x128xf32>
    %28 = vector.extract_strided_slice %8 {offsets = [0, 0], sizes = [2, 128], strides = [1, 1]} : vector<2x1024xf32> to vector<2x128xf32>
    %29 = vector.extract_strided_slice %8 {offsets = [0, 128], sizes = [2, 128], strides = [1, 1]} : vector<2x1024xf32> to vector<2x128xf32>
    %30 = vector.extract_strided_slice %8 {offsets = [0, 256], sizes = [2, 128], strides = [1, 1]} : vector<2x1024xf32> to vector<2x128xf32>
    %31 = vector.extract_strided_slice %8 {offsets = [0, 384], sizes = [2, 128], strides = [1, 1]} : vector<2x1024xf32> to vector<2x128xf32>
    %32 = vector.extract_strided_slice %8 {offsets = [0, 512], sizes = [2, 128], strides = [1, 1]} : vector<2x1024xf32> to vector<2x128xf32>
    %33 = vector.extract_strided_slice %8 {offsets = [0, 640], sizes = [2, 128], strides = [1, 1]} : vector<2x1024xf32> to vector<2x128xf32>
    %34 = vector.extract_strided_slice %8 {offsets = [0, 768], sizes = [2, 128], strides = [1, 1]} : vector<2x1024xf32> to vector<2x128xf32>
    %35 = vector.extract_strided_slice %8 {offsets = [0, 896], sizes = [2, 128], strides = [1, 1]} : vector<2x1024xf32> to vector<2x128xf32>
    %36 = arith.addf %28, %29 : vector<2x128xf32>
    %37 = arith.addf %30, %31 : vector<2x128xf32>
    %38 = arith.addf %32, %33 : vector<2x128xf32>
    %39 = arith.addf %34, %35 : vector<2x128xf32>
    %40 = arith.addf %36, %37 : vector<2x128xf32>
    %41 = arith.addf %38, %39 : vector<2x128xf32>
    %42 = arith.addf %40, %41 : vector<2x128xf32>
    %43 = arith.addf %27, %42 : vector<2x128xf32>
    %c0_10 = arith.constant 0 : index
    %c0_11 = arith.constant 0 : index
    %44 = vector.load %arg6[%c0_10, %c0_11] : memref<2x128xf32, #tpu.memory_space<vmem>>, vector<2x128xf32>
    tpu.vector_store %arg6[%c0_10, %c0_11], %43 {strides = array<i32>} : memref<2x128xf32, #tpu.memory_space<vmem>>, vector<2x128xf32>,
    %c0_i32_12 = arith.constant 0 : i32
    %45 = arith.cmpi eq, %arg1, %c0_i32_12 : i32
    %46 = arith.extui %45 : i1 to i32
    %c0_i32_13 = arith.constant 0 : i32
    %47 = arith.cmpi ne, %46, %c0_i32_13 : i32
    scf.if %47 {
      %c0_14 = arith.constant 0 : index
      %c0_15 = arith.constant 0 : index
      %48 = vector.load %arg5[%c0_14, %c0_15] : memref<2x128xf32, #tpu.memory_space<vmem>>, vector<2x128xf32>
      %cst = arith.constant dense<0.000000e+00> : vector<2xf32>
      %49 = vector.multi_reduction <add>, %48, %cst [1] : vector<2x128xf32> to vector<2xf32>
      %50 = vector.shape_cast %49 : vector<2xf32> to vector<2x1xf32>
      %cst_16 = arith.constant 1.000000e+00 : f32
      %51 = vector.broadcast %cst_16 : f32 to vector<2x1xf32>
      %52 = arith.addf %50, %51 : vector<2x1xf32>
      %c0_17 = arith.constant 0 : index
      %c0_18 = arith.constant 0 : index
      %53 = vector.load %arg6[%c0_17, %c0_18] : memref<2x128xf32, #tpu.memory_space<vmem>>, vector<2x128xf32>
      %cst_19 = arith.constant dense<0.000000e+00> : vector<2xf32>
      %54 = vector.multi_reduction <add>, %53, %cst_19 [1] : vector<2x128xf32> to vector<2xf32>
      %55 = vector.shape_cast %54 : vector<2xf32> to vector<2x1xf32>
      %cst_20 = arith.constant 1.000000e+00 : f32
      %56 = vector.broadcast %cst_20 : f32 to vector<2x1xf32>
      %57 = arith.addf %55, %56 : vector<2x1xf32>
      %58 = arith.divf %52, %57 : vector<2x1xf32>
      %cst_21 = arith.constant 1.000000e+00 : f32
      %59 = vector.broadcast %cst_21 : f32 to vector<2x1xf32>
      %60 = arith.subf %59, %58 : vector<2x1xf32>
      %c0_22 = arith.constant 0 : index
      %c0_23 = arith.constant 0 : index
      %61 = vector.load %arg4[%c0_22, %c0_23] : memref<2x1xf32, #tpu.memory_space<vmem>>, vector<2x1xf32>
      tpu.vector_store %arg4[%c0_22, %c0_23], %60 {strides = array<i32>} : memref<2x1xf32, #tpu.memory_space<vmem>>, vector<2x1xf32>,
    } else {
    }
    return
  }
  func.func @transform_0(%arg0: i32, %arg1: i32) -> (i32, i32) {
    %c0_i32 = arith.constant 0 : i32
    return %arg0, %arg1 : i32, i32
  }
  func.func @transform_1(%arg0: i32, %arg1: i32) -> (i32, i32) {
    %c0_i32 = arith.constant 0 : i32
    return %arg0, %arg1 : i32, i32
  }
  func.func @transform_2(%arg0: i32, %arg1: i32) -> (i32, i32) {
    %c0_i32 = arith.constant 0 : i32
    %c0_i32_0 = arith.constant 0 : i32
    return %arg0, %c0_i32 : i32, i32
  }
}

</mosaic_0001>

<bundles_post_ra>
// kernel: tpu_custom_call.1
= control target key start
LH: loop header
LB: loop body
LE: loop exit
PB: predicated region body
PF: predicated region fallthrough
CT: control target
= control target key end

     0   :  { %7 = vsyncpa [#allocation5], 0  ;;  %s227_s0 = inlined_call_operand.hbm [shape: f32[2,1024], index: 0, kind: input, shape index: {}]   ;;  %s228_s1 = inlined_call_operand.hbm [shape: f32[2,1024], index: 1, kind: input, shape index: {}]   ;;  %s229_s2 = inlined_call_operand.vmem [shape: f32[2,1], index: 2, kind: output, shape index: {}]  }
   0x1   :  { %s14_s11 = sshll.u32 %s227_s0, 4  ;;  %s15_s11 = int_to_ptr.hbm [resolvable:$true] %s14_s11 }
   0x2   :  { %8 = vsyncpa [#allocation7], 0  ;;  %s200_s12 = smov [#allocation4]   ;;  %s25_s16 = sshll.u32 %s228_s1, 4  ;;  %s26_s16 = int_to_ptr.hbm [resolvable:$true] %s25_s16 }
   0x3   :  { %s16_s13 = sshll.u32 %s200_s12, 4  ;;  %s201_s17 = smov [#allocation6]   ;;  %s17_s13 = int_to_ptr.vmem [resolvable:$true] %s16_s13 }
   0x4   :  { %19 = dma.hbm_to_vmem [thread:$0]  %s15_s11, 256, %s17_s13, [#allocation5]  }
   0x5   :  { %s27_s18 = sshll.u32 %s201_s17, 4  ;;  %s28_s18 = int_to_ptr.vmem [resolvable:$true] %s27_s18 }
   0x6   :  { %30 = dma.hbm_to_vmem [thread:$0]  %s26_s16, 256, %s28_s18, [#allocation7]  }
   0x7   :  { %196 = dma.done.wait [#allocation5], 256  }
   0x8   :  { %197 = vsyncadd [#allocation5], 4294967040 }
   0x9   :  { %198 = dma.done.wait [#allocation7], 256  }
   0xa   :  { %199 = vsyncadd [#allocation7], 4294967040  ;;  %v202_v0 = vmov 0.0   ;;  %v45_v1 = vld [vmem:[#allocation4] sm:$0xff]  ;;  %v46_v2 = vld [vmem:[#allocation4 + $0x8] sm:$0xff]  ;;  %vm109_vm0 = vcmask 1041408  }
   0xb   :  { %44 = vst [vmem:[#allocation3] sm:$0x3] %v202_v0  ;;  %v47_v3 = vld [vmem:[#allocation6] sm:$0xff]  ;;  %v48_v4 = vld [vmem:[#allocation6 + $0x8] sm:$0xff]  ;;  %v51_v5 = vmul.f32 %v45_v1, %v45_v1  ;;  %v52_v6 = vmul.f32 %v46_v2, %v46_v2  ;;  %vm135_vm5 = vcmask 1024  }
   0xc   :  { %43 = vst [vmem:[#allocation2] sm:$0x3] %v202_v0  ;;  %v53_v7 = vmul.f32 %v47_v3, %v47_v3  ;;  %v49_v8 = vmul.f32 %v47_v3, %v45_v1  ;;  %v54_v9 = vmul.f32 %v48_v4, %v48_v4  ;;  %v50_v10 = vmul.f32 %v48_v4, %v46_v2 }
   0xe   :  { %v55_v11 = vadd.f32 %v53_v7, %v51_v5  ;;  %v59_v12 = vrot.slane %v49_v8, 2  ;;  %v62_v13 = vrot.slane %v49_v8, 4  ;;  %v64_v14 = vrot.slane %v49_v8, 6 }
   0xf   :  { %v56_v15 = vadd.f32 %v54_v9, %v52_v6  ;;  %v68_v16 = vrot.slane %v50_v10, 2  ;;  %v71_v17 = vrot.slane %v50_v10, 4  ;;  %v73_v18 = vrot.slane %v50_v10, 6 }
  0x10   :  { %v83_v19 = vrot.slane %v55_v11, 2  ;;  %v86_v20 = vrot.slane %v55_v11, 4  ;;  %v88_v21 = vrot.slane %v55_v11, 6  ;;  %v61_v22 = vadd.f32 %v59_v12, %v49_v8 }
  0x11   :  { %v92_v23 = vrot.slane %v56_v15, 2  ;;  %v95_v24 = vrot.slane %v56_v15, 4  ;;  %v97_v25 = vrot.slane %v56_v15, 6  ;;  %v66_v26 = vadd.f32 %v64_v14, %v62_v13 }
  0x12   :  { %v85_v27 = vadd.f32 %v83_v19, %v55_v11  ;;  %v90_v28 = vadd.f32 %v88_v21, %v86_v20  ;;  %v70_v29 = vadd.f32 %v68_v16, %v50_v10  ;;  %v75_v30 = vadd.f32 %v73_v18, %v71_v17  ;;  %v81_v38 = vld [vmem:[#allocation3] sm:$0x3] }
  0x13   :  { %v94_v31 = vadd.f32 %v92_v23, %v56_v15  ;;  %v99_v32 = vadd.f32 %v97_v25, %v95_v24  ;;  %v76_v33 = vadd.f32 %v66_v26, %v61_v22  ;;  %v57_v37 = vld [vmem:[#allocation2] sm:$0x3] }
  0x14   :  { %v100_v34 = vadd.f32 %v90_v28, %v85_v27  ;;  %v77_v35 = vadd.f32 %v75_v30, %v70_v29 }
  0x15   :  { %v101_v36 = vadd.f32 %v99_v32, %v94_v31 }
  0x16   :  { %v78_v39 = vadd.f32 %v77_v35, %v76_v33 }
  0x17   :  { %v102_v40 = vadd.f32 %v101_v36, %v100_v34 }
  0x18   :  { %v79_v41 = vadd.f32 %v78_v39, %v57_v37 }
  0x19   :  { %v103_v42 = vadd.f32 %v102_v40, %v81_v38 }
  0x1a   :  { %80 = vst [vmem:[#allocation2] sm:$0x3] %v79_v41 }
  0x1b   :  { %104 = vst [vmem:[#allocation3] sm:$0x3] %v103_v42 }
  0x21   :  { %v108_v45 = vld [vmem:[#allocation2] sm:$0x3] }
  0x22   :  { %v114_v43 = vld [vmem:[#allocation3] sm:$0x3]  ;;  %v110_v46 = vsel %vm109_vm0, %v108_v45, 0.0 }
  0x23   :  { %v115_v44 = vsel %vm109_vm0, %v114_v43, 0.0 }
  0x24   :  { %116 = vadd.xlane.f32.xlu0 %v115_v44 }
  0x2c   :  { %111 = vadd.xlane.f32.xlu0 %v110_v46 }
  0x97   :  { %v117_v47 = vpop.xlane.xlu0 %116 }
  0x98   :  { %v118_v48 = vadd.f32 1.0, %v117_v47 }
  0x9a   :  { %146 = vrcp.f32 %v118_v48  ;;  %v130_v52 = vand.u32 2147483648, %v118_v48  ;;  %v128_v55 = vand.u32 2147483647, %v118_v48  ;;  %vm124_vm2 = vweird.f32 %v118_v48 }
  0x9c   :  { %v131_v58 = vor.u32 1.1754944e-38, %v130_v52  ;;  %vm129_vm4 = vcmp.eq.f32.partialorder %v128_v55, 8.507059e+37 }
  0x9f   :  { %v112_v53 = vpop.xlane.xlu0 %111 }
  0xa0   :  { %v147_v49 = vpop.eup %146  ;;  %v113_v57 = vadd.f32 1.0, %v112_v53 }
  0xa1   :  { %v120_v50 = vmul.f32 %v147_v49, %v118_v48  ;;  %vm125_vm1 = vweird.f32 %v147_v49 }
  0xa2   :  { %vm126_vm3 = vmor %vm124_vm2, %vm125_vm1 }
  0xa3   :  { %v121_v51 = vsub.f32 1.0, %v120_v50 }
  0xa5   :  { %v122_v54 = vmul.f32 %v147_v49, %v121_v51 }
  0xa7   :  { %v123_v56 = vadd.f32 %v147_v49, %v122_v54 }
  0xa9   :  { %v127_v59 = vsel %vm126_vm3, %v147_v49, %v123_v56 }
  0xaa   :  { %v132_v60 = vsel %vm129_vm4, %v131_v58, %v127_v59 }
  0xab   :  { %v133_v61 = vmul.f32 %v132_v60, %v113_v57 }
  0xad   :  { %v134_v62 = vsub.f32 1.0, %v133_v61 }
  0xaf   :  { %136 = vst.msk [vmem:[%s229_s2] sm:$0x3] %vm135_vm5, %v134_v62 }
  0xb0   :  { %141 = vsyncpa [#allocation5], 1 }
  0xb1   :  { %142 = vsyncpa [#allocation7], 1 }

</bundles_post_ra>
